<compile_context>
chip_gen: v6e
topology: v6e:2x2x1
jax: 0.10.0
libtpu: 0.0.40
codegen_flags: <defaults>
</compile_context>

<pallas_src>
import functools

import jax
import jax.numpy as jnp
from jax.experimental import pallas as pl
from jax.experimental.pallas import tpu as pltpu


# ----------------------------------------------------------------------------
# small helpers
# ----------------------------------------------------------------------------
def _round_up(x, m):
    return ((x + m - 1) // m) * m


def _vmem_capacity_bytes():
    try:
        return int(pltpu.get_tpu_info().vmem_capacity_bytes)
    except Exception:
        return 64 * 1024 * 1024          # conservative fallback (v7x per-TensorCore)


def _vmem_limit_bytes(needed):
    cap = _vmem_capacity_bytes()
    want = max(int(needed) + (4 << 20), 32 << 20)
    return int(min(want, cap - (2 << 20)))


def _tile_and_pad(dim, cap, align):
    """(tile, padded_dim): full-dim block if it fits under cap, else aligned cap-sized tiles."""
    if dim <= cap:
        return dim, dim
    tile = (cap // align) * align
    return tile, _round_up(dim, tile)


def _pad_gate_axis(a, h, hp, axis):
    """Pad a 4H gate axis [i|f|g|o] so each gate block grows from h to hp columns (zero fill)."""
    if h == hp:
        return a
    shape = a.shape
    a4 = a.reshape(shape[:axis] + (4, h) + shape[axis + 1:])
    pad = [(0, 0)] * a4.ndim
    pad[axis + 1] = (0, hp - h)
    return jnp.pad(a4, pad).reshape(shape[:axis] + (4 * hp,) + shape[axis + 1:])


# ----------------------------------------------------------------------------
# generic tiled  (M,K) @ (K,N) + bias(1,N)  kernel  (used for input & dense projections)
# ----------------------------------------------------------------------------
def _matmul_bias_kernel(x_ref, w_ref, b_ref, o_ref, acc_ref):
    k = pl.program_id(2)

    @pl.when(k == 0)
    def _():
        acc_ref[...] = jnp.zeros_like(acc_ref)

    acc_ref[...] += jnp.dot(x_ref[...], w_ref[...],
                            preferred_element_type=jnp.float32)

    @pl.when(k == pl.num_programs(2) - 1)
    def _():
        o_ref[...] = (acc_ref[...] + b_ref[...]).astype(o_ref.dtype)


def matmul_bias(x, w, b, *, operand_dtype=jnp.bfloat16, out_dtype=jnp.float32,
                tm_cap=256, tn_cap=None, tk_cap=None):
    """y = x @ w + b with x:(M,K), w:(K,N), b:(1,N) -> (M,N) out_dtype.

    MXU operands are cast to `operand_dtype` (bf16 default -> native MXU, f32 accumulation);
    bias / accumulator / output stay f32.  Arbitrary M/N/K handled via zero padding.
    """
    isz = jnp.dtype(operand_dtype).itemsize
    if tn_cap is None:
        tn_cap = 1024 if isz <= 2 else 512
    if tk_cap is None:
        tk_cap = 1024 if isz <= 2 else 512

    M, K = x.shape
    _, N = w.shape
    tm, Mp = _tile_and_pad(M, tm_cap, 8)
    tn, Np = _tile_and_pad(N, tn_cap, 128)
    tk, Kp = _tile_and_pad(K, tk_cap, 128)

    x = x.astype(operand_dtype)
    w = w.astype(operand_dtype)
    b = b.astype(jnp.float32)
    if (Mp, Kp) != (M, K):
        x = jnp.pad(x, ((0, Mp - M), (0, Kp - K)))
    if (Kp, Np) != (K, N):
        w = jnp.pad(w, ((0, Kp - K), (0, Np - N)))
    if Np != N:
        b = jnp.pad(b, ((0, 0), (0, Np - N)))

    grid = (Mp // tm, Np // tn, Kp // tk)
    needed = (2 * (tm * tk + tk * tn) * isz       # double-buffered operand tiles
              + 2 * tn * 4                        # bias tile
              + 2 * tm * tn * jnp.dtype(out_dtype).itemsize
              + tm * tn * 4)                      # f32 accumulator scratch

    out = pl.pallas_call(
        _matmul_bias_kernel,
        out_shape=jax.ShapeDtypeStruct((Mp, Np), out_dtype),
        grid_spec=pltpu.PrefetchScalarGridSpec(
            num_scalar_prefetch=0,
            grid=grid,
            in_specs=[
                pl.BlockSpec((tm, tk), lambda i, j, k: (i, k)),   # x tile
                pl.BlockSpec((tk, tn), lambda i, j, k: (k, j)),   # w tile
                pl.BlockSpec((1, tn), lambda i, j, k: (0, j)),    # bias tile
            ],
            out_specs=pl.BlockSpec((tm, tn), lambda i, j, k: (i, j)),
            scratch_shapes=[pltpu.VMEM((tm, tn), jnp.float32)],
        ),
        compiler_params=pltpu.CompilerParams(
            dimension_semantics=("parallel", "parallel", "arbitrary"),
            vmem_limit_bytes=_vmem_limit_bytes(needed)),
    )(x, w, b)

    if (Mp, Np) != (M, N):
        out = out[:M, :N]
    return out


# ----------------------------------------------------------------------------
# serial LSTM recurrence kernel: time loop lives INSIDE the kernel
# ----------------------------------------------------------------------------
def _lstm_recurrence_kernel(gx_ref, whh_ref, h0_ref, c0_ref,
                            hs_ref, hn_ref, cn_ref,
                            h_sc, c_sc, *, t_chunk, t_real, needs_mask):
    chunk = pl.program_id(0)

    @pl.when(chunk == 0)
    def _():
        h_sc[...] = h0_ref[...]
        c_sc[...] = c0_ref[...]

    Hp = h_sc.shape[-1]
    whh = whh_ref[...]                     # hoist: W_hh^T resident across the whole time chunk
    t_base = chunk * t_chunk

    def step(tt, carry):
        h, c = carry
        # input projection + bias were precomputed (hoisted); only the recurrent matmul +
        # gate nonlinearities remain on the serial path.  Hp is a multiple of 128, so every
        # gate slice is lane-aligned and every store is lane-dense.
        gates = gx_ref[tt] + jnp.dot(h, whh, preferred_element_type=jnp.float32)
        i_g = jax.nn.sigmoid(gates[:, 0 * Hp:1 * Hp])
        f_g = jax.nn.sigmoid(gates[:, 1 * Hp:2 * Hp])
        g_g = jnp.tanh(gates[:, 2 * Hp:3 * Hp])
        o_g = jax.nn.sigmoid(gates[:, 3 * Hp:4 * Hp])
        c_new = f_g * c + i_g * g_g
        h_new = o_g * jnp.tanh(c_new)
        # batch-major hidden-state write: hs block is (Bp, TC, Hp) -> no post-kernel transpose.
        hs_ref[:, pl.ds(tt, 1), :] = h_new[:, None, :]
        if needs_mask:                      # only traced when T was padded up to T_pad
            valid = (t_base + tt) < t_real
            h_new = jnp.where(valid, h_new, h)
            c_new = jnp.where(valid, c_new, c)
        return (h_new, c_new)

    unroll = t_chunk if t_chunk <= 8 else 8   # bounded unroll: avoids vreg spill at large H
    h_fin, c_fin = jax.lax.fori_loop(0, t_chunk, step,
                                     (h_sc[...], c_sc[...]), unroll=unroll)

    # persist carry across grid chunks
    h_sc[...] = h_fin
    c_sc[...] = c_fin

    @pl.when(chunk == pl.num_programs(0) - 1)
    def _():
        hn_ref[...] = h_fin
        cn_ref[...] = c_fin


def _pick_t_chunk(T, Bp, Hp):
    """Largest VMEM-budget-aware timestep chunk (multiple of 8, or the full T)."""
    vmem = _vmem_capacity_bytes()
    fixed = 2 * Hp * (4 * Hp) * 4 + 8 * Bp * Hp * 4            # W_hh (dbl-buf) + carries/h0/c0/hn/cn
    per_t = 2 * Bp * (4 * Hp) * 4 + 2 * Bp * Hp * 4            # dbl-buffered gx + hs per timestep
    budget = int(vmem * 0.4) - fixed
    tc = max(8, budget // max(per_t, 1))
    tc = min(tc, 256)
    if T <= tc:
        return T, T
    tc = (tc // 8) * 8
    return tc, _round_up(T, tc)


def lstm_recurrence(gx, whh_t, h0, c0):
    """gx: (T, Bp, 4Hp) precomputed x@W_ih^T + b (time-major), Bp%8==0, Hp%128==0.

    Returns (hs (Bp, T_pad, Hp) batch-major, h_n (Bp, Hp), c_n (Bp, Hp)).
    """
    T, Bp, G = gx.shape
    Hp = whh_t.shape[0]

    TC, T_pad = _pick_t_chunk(T, Bp, Hp)
    if T_pad != T:
        gx = jnp.pad(gx, ((0, T_pad - T), (0, 0), (0, 0)))
    NC = T_pad // TC

    kernel = functools.partial(_lstm_recurrence_kernel,
                               t_chunk=TC, t_real=T, needs_mask=(T_pad != T))

    needed = (2 * TC * Bp * G * 4          # gx chunks (double-buffered)
              + 2 * Hp * G * 4             # W_hh^T
              + 4 * Bp * Hp * 4            # h0, c0
              + 2 * Bp * TC * Hp * 4       # hs chunks (double-buffered)
              + 6 * Bp * Hp * 4)           # h_n, c_n, carries

    return pl.pallas_call(
        kernel,
        out_shape=(
            jax.ShapeDtypeStruct((Bp, T_pad, Hp), jnp.float32),   # hidden states, batch-major
            jax.ShapeDtypeStruct((Bp, Hp), jnp.float32),          # h_n
            jax.ShapeDtypeStruct((Bp, Hp), jnp.float32),          # c_n
        ),
        grid_spec=pltpu.PrefetchScalarGridSpec(
            num_scalar_prefetch=0,
            grid=(NC,),
            in_specs=[
                pl.BlockSpec((TC, Bp, G), lambda i: (i, 0, 0)),   # gates_x chunk (time-major)
                pl.BlockSpec((Hp, G), lambda i: (0, 0)),          # W_hh^T (resident)
                pl.BlockSpec((Bp, Hp), lambda i: (0, 0)),         # h0
                pl.BlockSpec((Bp, Hp), lambda i: (0, 0)),         # c0
            ],
            out_specs=[
                pl.BlockSpec((Bp, TC, Hp), lambda i: (0, i, 0)),  # hidden states chunk
                pl.BlockSpec((Bp, Hp), lambda i: (0, 0)),         # h_n
                pl.BlockSpec((Bp, Hp), lambda i: (0, 0)),         # c_n
            ],
            scratch_shapes=[
                pltpu.VMEM((Bp, Hp), jnp.float32),                # h carry
                pltpu.VMEM((Bp, Hp), jnp.float32),                # c carry
            ],
        ),
        compiler_params=pltpu.CompilerParams(
            dimension_semantics=("arbitrary",),                    # sequential recurrence
            vmem_limit_bytes=_vmem_limit_bytes(needed)),
    )(gx, whh_t, h0, c0)


# ----------------------------------------------------------------------------
# full forward pass
# ----------------------------------------------------------------------------
def lstm_forward(token_ids, state, params, *, mxu_dtype=jnp.bfloat16):
    """Pallas implementation of LSTMModel.forward.

    token_ids: (B, T) int32
    state:     (h0, c0) each (1, B, H)
    returns:   (logits (B*T, V), (h_n, c_n))
    """
    emb = params["embedding"]          # (V, E)
    wih_t = params["w_ih_t"]           # (E, 4H)
    whh_t = params["w_hh_t"]           # (H, 4H)
    b = params["b_lstm"]               # (1, 4H)
    wd_t = params["w_dense_t"]         # (H, V)
    bd = params["b_dense"]             # (1, V)

    B, T = token_ids.shape
    V, E = emb.shape
    H = whh_t.shape[0]

    # pad batch to a sublane multiple (8) and hidden to a lane multiple (128).
    # Zero padding is exact: padded gate columns are 0 -> padded h/c columns stay exactly 0,
    # padded rows/columns are sliced off before returning.
    Bp = _round_up(B, 8)
    Hp = _round_up(H, 128)

    wih_t_p = _pad_gate_axis(wih_t, H, Hp, axis=1)                                    # (E, 4Hp)
    whh_t_p = _pad_gate_axis(jnp.pad(whh_t, ((0, Hp - H), (0, 0))), H, Hp, axis=1)    # (Hp, 4Hp)
    b_p = _pad_gate_axis(b, H, Hp, axis=1)                                            # (1, 4Hp)
    wd_t_p = jnp.pad(wd_t, ((0, Hp - H), (0, 0)))                                     # (Hp, V)
    h0 = jnp.pad(state[0][0], ((0, Bp - B), (0, Hp - H)))                             # (Bp, Hp)
    c0 = jnp.pad(state[1][0], ((0, Bp - B), (0, Hp - H)))                             # (Bp, Hp)

    ids = token_ids.astype(jnp.int32)
    if Bp != B:
        ids = jnp.pad(ids, ((0, Bp - B), (0, 0)))

    # embedding lookup (glue), gathered directly in time-major order (T, Bp, E)
    # TODO(synk): for large E the gather could be fused into stage 1 via scalar-prefetched ids.
    x_tm = jnp.take(emb, ids.T, axis=0)

    # stage 1: time-parallel input projection (bf16 MXU operands, f32 accumulation, bias folded in)
    gx = matmul_bias(x_tm.reshape(T * Bp, E), wih_t_p, b_p,
                     operand_dtype=mxu_dtype).reshape(T, Bp, 4 * Hp)

    # stage 2: serial recurrence (in-kernel time loop, f32 gate math), hidden states batch-major
    hs, h_n, c_n = lstm_recurrence(gx, whh_t_p, h0, c0)

    # stage 3: dense/vocab projection straight off the batch-major hidden states; logits come
    # out directly in PyTorch's (b*T + t) row order -- no transpose of the big tensors.
    out_bt = hs[:B, :T, :].reshape(B * T, Hp)
    logits = matmul_bias(out_bt, wd_t_p, bd, operand_dtype=mxu_dtype)                 # (B*T, V)

    return logits, (h_n[:B, :H][None, ...], c_n[:B, :H][None, ...])


# ----------------------------------------------------------------------------
# pure-JAX reference (PyTorch nn.LSTM semantics, gate order i,f,g,o)
# ----------------------------------------------------------------------------
def reference_forward(token_ids, state, params):
    emb = params["embedding"]
    wih_t = params["w_ih_t"]
    whh_t = params["w_hh_t"]
    b = params["b_lstm"][0]
    wd_t = params["w_dense_t"]
    bd = params["b_dense"][0]
    H = whh_t.shape[0]

    x = jnp.take(emb, token_ids.astype(jnp.int32), axis=0)   # (B, T, E)

    def step(carry, x_t):
        h, c = carry
        gates = x_t @ wih_t + h @ whh_t + b
        i = jax.nn.sigmoid(gates[:, 0 * H:1 * H])
        f = jax.nn.sigmoid(gates[:, 1 * H:2 * H])
        g = jnp.tanh(gates[:, 2 * H:3 * H])
        o = jax.nn.sigmoid(gates[:, 3 * H:4 * H])
        c = f * c + i * g
        h = o * jnp.tanh(c)
        return (h, c), h

    h0, c0 = state[0][0], state[1][0]
    (h_n, c_n), hs = jax.lax.scan(step, (h0, c0), jnp.transpose(x, (1, 0, 2)))
    out = jnp.transpose(hs, (1, 0, 2))                        # (B, T, H)
    logits = out.reshape(-1, H) @ wd_t + bd
    return logits, (h_n[None, ...], c_n[None, ...])


def init_params(key, vocab_size, embedding_dim, hidden_size):
    ks = jax.random.split(key, 7)
    H = hidden_size
    scale = 0.1
    return {
        "embedding": jax.random.normal(ks[0], (vocab_size, embedding_dim), jnp.float32) * scale,
        # stored pre-transposed (x @ W^T form)
        "w_ih_t": jax.random.normal(ks[1], (embedding_dim, 4 * H), jnp.float32) * scale,
        "w_hh_t": jax.random.normal(ks[2], (H, 4 * H), jnp.float32) * scale,
        # combined b_ih + b_hh
        "b_lstm": jax.random.normal(ks[3], (1, 4 * H), jnp.float32) * scale,
        "w_dense_t": jax.random.normal(ks[4], (H, vocab_size), jnp.float32) * scale,
        "b_dense": jax.random.normal(ks[5], (1, vocab_size), jnp.float32) * scale,
    }


if __name__ == "__main__":
    B, T = 2, 8
    vocab_size, embedding_dim, hidden_size = 32, 16, 32

    key = jax.random.PRNGKey(0)
    k_tok, k_params = jax.random.split(key)

    params = init_params(k_params, vocab_size, embedding_dim, hidden_size)
    token_ids = jax.random.randint(k_tok, (B, T), 0, vocab_size, dtype=jnp.int32)
    h0 = jnp.zeros((1, B, hidden_size), jnp.float32)
    c0 = jnp.zeros((1, B, hidden_size), jnp.float32)

    ref_logits, (ref_h, ref_c) = reference_forward(token_ids, (h0, c0), params)

    # exact-path check: f32 MXU operands must match the f32 reference tightly
    logits, (h_n, c_n) = lstm_forward(token_ids, (h0, c0), params, mxu_dtype=jnp.float32)
    jax.block_until_ready((logits, h_n, c_n))
    assert logits.shape == (B * T, vocab_size)
    assert h_n.shape == (1, B, hidden_size) and c_n.shape == (1, B, hidden_size)
    assert jnp.allclose(logits, ref_logits, atol=1e-4, rtol=1e-4)
    assert jnp.allclose(h_n, ref_h, atol=1e-4, rtol=1e-4)
    assert jnp.allclose(c_n, ref_c, atol=1e-4, rtol=1e-4)

    # perf-default path: bf16 MXU operands (f32 accumulation) for the two large matmuls
    logits_bf, (h_bf, c_bf) = lstm_forward(token_ids, (h0, c0), params)
    jax.block_until_ready((logits_bf, h_bf, c_bf))
    assert logits_bf.shape == (B * T, vocab_size)
    assert jnp.allclose(logits_bf, ref_logits, atol=3e-2, rtol=3e-2)
    assert jnp.allclose(h_bf, ref_h, atol=3e-2, rtol=3e-2)
    assert jnp.allclose(c_bf, ref_c, atol=3e-2, rtol=3e-2)

    print("KERNEL_OK")
</pallas_src>

<mosaic_0001>
module attributes {stable_mosaic.version = 11 : i64} {
  func.func @_matmul_bias_kernel(%arg0: i32, %arg1: i32, %arg2: i32, %arg3: memref<64x16xf32, #tpu.memory_space<vmem>>, %arg4: memref<16x512xf32, #tpu.memory_space<vmem>>, %arg5: memref<1x512xf32, #tpu.memory_space<vmem>>, %arg6: memref<64x512xf32, #tpu.memory_space<vmem>>, %arg7: memref<64x512xf32, #tpu.memory_space<vmem>>) attributes {dimension_semantics = [#tpu.dimension_semantics<parallel>, #tpu.dimension_semantics<parallel>, #tpu.dimension_semantics<arbitrary>], iteration_bounds = array<i64: 1, 1, 1>, scalar_prefetch = 0 : i64, scratch_operands = 1 : i64, tpu.core_type = #tpu.core_type<tc>, window_params = [{transform_indices = @transform_0, window_bounds = array<i64: 64, 16>}, {transform_indices = @transform_1, window_bounds = array<i64: 16, 512>}, {transform_indices = @transform_2, window_bounds = array<i64: 1, 512>}, {transform_indices = @transform_3, window_bounds = array<i64: 64, 512>}]} {
    %c0_i32 = arith.constant 0 : i32
    %0 = arith.cmpi eq, %arg2, %c0_i32 : i32
    %1 = arith.extui %0 : i1 to i32
    %c0_i32_0 = arith.constant 0 : i32
    %2 = arith.cmpi ne, %1, %c0_i32_0 : i32
    scf.if %2 {
      %cst_10 = arith.constant 0.000000e+00 : f32
      %12 = vector.broadcast %cst_10 : f32 to vector<64x512xf32>
      %c0_11 = arith.constant 0 : index
      %c0_12 = arith.constant 0 : index
      %13 = vector.load %arg7[%c0_11, %c0_12] : memref<64x512xf32, #tpu.memory_space<vmem>>, vector<64x512xf32>
      tpu.vector_store %arg7[%c0_11, %c0_12], %12 {strides = array<i32>} : memref<64x512xf32, #tpu.memory_space<vmem>>, vector<64x512xf32>,
    } else {
    }
    %c0 = arith.constant 0 : index
    %c0_1 = arith.constant 0 : index
    %3 = vector.load %arg7[%c0, %c0_1] : memref<64x512xf32, #tpu.memory_space<vmem>>, vector<64x512xf32>
    %c0_2 = arith.constant 0 : index
    %c0_3 = arith.constant 0 : index
    %4 = vector.load %arg3[%c0_2, %c0_3] : memref<64x16xf32, #tpu.memory_space<vmem>>, vector<64x16xf32>
    %c0_4 = arith.constant 0 : index
    %c0_5 = arith.constant 0 : index
    %5 = vector.load %arg4[%c0_4, %c0_5] : memref<16x512xf32, #tpu.memory_space<vmem>>, vector<16x512xf32>
    %cst = arith.constant dense<0.000000e+00> : vector<64x512xf32>
    %6 = tpu.matmul %4, %5, %cst {dimension_numbers = #tpu.dot_dimension_numbers<[1], [0], [0], [1], [0, 0, 1, 1], [], []>} : vector<64x16xf32>, vector<16x512xf32>, vector<64x512xf32> -> vector<64x512xf32>
    %7 = arith.addf %3, %6 : vector<64x512xf32>
    %c0_6 = arith.constant 0 : index
    %c0_7 = arith.constant 0 : index
    %8 = vector.load %arg7[%c0_6, %c0_7] : memref<64x512xf32, #tpu.memory_space<vmem>>, vector<64x512xf32>
    tpu.vector_store %arg7[%c0_6, %c0_7], %7 {strides = array<i32>} : memref<64x512xf32, #tpu.memory_space<vmem>>, vector<64x512xf32>,
    %c0_i32_8 = arith.constant 0 : i32
    %9 = arith.cmpi eq, %arg2, %c0_i32_8 : i32
    %10 = arith.extui %9 : i1 to i32
    %c0_i32_9 = arith.constant 0 : i32
    %11 = arith.cmpi ne, %10, %c0_i32_9 : i32
    scf.if %11 {
      %c0_10 = arith.constant 0 : index
      %c0_11 = arith.constant 0 : index
      %12 = vector.load %arg7[%c0_10, %c0_11] : memref<64x512xf32, #tpu.memory_space<vmem>>, vector<64x512xf32>
      %c0_12 = arith.constant 0 : index
      %c0_13 = arith.constant 0 : index
      %13 = vector.load %arg5[%c0_12, %c0_13] : memref<1x512xf32, #tpu.memory_space<vmem>>, vector<1x512xf32>
      %14 = vector.broadcast %13 : vector<1x512xf32> to vector<64x512xf32>
      %15 = arith.addf %12, %14 : vector<64x512xf32>
      %c0_14 = arith.constant 0 : index
      %c0_15 = arith.constant 0 : index
      %16 = vector.load %arg6[%c0_14, %c0_15] : memref<64x512xf32, #tpu.memory_space<vmem>>, vector<64x512xf32>
      tpu.vector_store %arg6[%c0_14, %c0_15], %15 {strides = array<i32>} : memref<64x512xf32, #tpu.memory_space<vmem>>, vector<64x512xf32>,
    } else {
    }
    return
  }
  func.func @transform_0(%arg0: i32, %arg1: i32, %arg2: i32) -> (i32, i32) {
    %c0_i32 = arith.constant 0 : i32
    return %arg0, %arg2 : i32, i32
  }
  func.func @transform_1(%arg0: i32, %arg1: i32, %arg2: i32) -> (i32, i32) {
    %c0_i32 = arith.constant 0 : i32
    return %arg2, %arg1 : i32, i32
  }
  func.func @transform_2(%arg0: i32, %arg1: i32, %arg2: i32) -> (i32, i32) {
    %c0_i32 = arith.constant 0 : i32
    %c0_i32_0 = arith.constant 0 : i32
    return %c0_i32, %arg1 : i32, i32
  }
  func.func @transform_3(%arg0: i32, %arg1: i32, %arg2: i32) -> (i32, i32) {
    %c0_i32 = arith.constant 0 : i32
    return %arg0, %arg1 : i32, i32
  }
}

</mosaic_0001>

<bundles_post_ra>
// kernel: tpu_custom_call.1
= control target key start
LH: loop header
LB: loop body
LE: loop exit
PB: predicated region body
PF: predicated region fallthrough
CT: control target
= control target key end

     0   :  { %vm99_vm0 = vcmask 130048   ;;  %v593_v9 = vmov 0.0   ;;  %s727_s0 = inlined_call_operand.vmem [shape: f32[64,16], index: 0, kind: input, shape index: {}]   ;;  %s728_s1 = inlined_call_operand.vmem [shape: f32[16,512], index: 1, kind: input, shape index: {}]   ;;  %s729_s2 = inlined_call_operand.vmem [shape: f32[1,512], index: 2, kind: input, shape index: {}]   ;;  %s730_s3 = inlined_call_operand.hbm [shape: f32[64,512], index: 3, kind: output, shape index: {}]  }
   0x1   :  { %v96_v0 = vld [vmem:[%s728_s1 + $0x28] sm:$0xff]  ;;  %v98_v1 = vld [vmem:[%s728_s1 + $0x38] sm:$0xff]  ;;  %v95_v2 = vld [vmem:[%s728_s1 + $0x20] sm:$0xff]  ;;  %188 = vmatprep.mubr.f32.mxu0 %v593_v9  ;;  %301 = vmatprep.mubr.f32.mxu1 %v593_v9 }
   0x2   :  { %152 = vmatprep.subr.mxu0 %v96_v0  ;;  %265 = vmatprep.subr.mxu1 %v98_v1  ;;  %v97_v3 = vld [vmem:[%s728_s1 + $0x30] sm:$0xff]  ;;  %v92_v4 = vld [vmem:[%s728_s1 + $0x8] sm:$0xff]  ;;  %v94_v5 = vld [vmem:[%s728_s1 + $0x18] sm:$0xff] }
   0x3   :  { %153 = vmatpush1.msra.mxu0 %v95_v2  ;;  %266 = vmatpush1.msra.mxu1 %v97_v3  ;;  %v91_v6 = vld [vmem:[%s728_s1] sm:$0xff]  ;;  %v93_v7 = vld [vmem:[%s728_s1 + $0x10] sm:$0xff] }
   0x4   :  { %154 = vmatprep.subr.mxu0 %v92_v4  ;;  %267 = vmatprep.subr.mxu1 %v94_v5  ;;  %v83_v8 = vld [vmem:[%s727_s0] sm:$0xff] }
   0x5   :  { %155 = vmatpush1.msra.mxu0 %v91_v6  ;;  %268 = vmatpush1.msra.mxu1 %v93_v7 }
   0x6   :  { %8 = vsyncpa [#allocation4], 0  ;;  %551 = vmatmul.mubr.msk.f32.vlgmr.msra.gmra.mxu0 %vm99_vm0, %v83_v8  ;;  %559 = vmatmul.mubr.msk.f32.vlgmr.msra.gmra.mxu1 %vm99_vm0, %v83_v8  ;;  %v84_v10 = vld [vmem:[%s727_s0 + $0x8] sm:$0xff]  ;;  %v85_v11 = vld [vmem:[%s727_s0 + $0x10] sm:$0xff]  ;;  %v451_v17 = vlaneseq }
   0x7   :  { %194 = vmatprep.mubr.f32.mxu0 %v593_v9  ;;  %307 = vmatprep.mubr.f32.mxu1 %v593_v9  ;;  %v86_v12 = vld [vmem:[%s727_s0 + $0x18] sm:$0xff]  ;;  %v87_v13 = vld [vmem:[%s727_s0 + $0x20] sm:$0xff]  ;;  %v88_v14 = vld [vmem:[%s727_s0 + $0x28] sm:$0xff] }
   0x8   :  { %v89_v15 = vld [vmem:[%s727_s0 + $0x30] sm:$0xff]  ;;  %v90_v16 = vld [vmem:[%s727_s0 + $0x38] sm:$0xff]  ;;  %v452_v18 = vshrl.u32 %v451_v17, 7  ;;  %v449_v21 = vld [vmem:[%s729_s2] sm:$0xf]  ;;  %s594_s0 = smov [#allocation3]  }
   0x9   :  { %s540_s2 = sshll.u32 %s594_s0, 4  ;;  %s541_s2 = int_to_ptr.vmem [resolvable:$true] %s540_s2 }
   0xa   :  { %552 = vmatmul.mubr.msk.f32.gmra.mxu0 %vm99_vm0, %v84_v10  ;;  %560 = vmatmul.mubr.msk.f32.gmra.mxu1 %vm99_vm0, %v84_v10  ;;  %v453_v19 = vsub.s32 0, %v452_v18  ;;  %v461_v20 = vsub.s32 2, %v452_v18  ;;  %v457_v22 = vsub.s32 1, %v452_v18  ;;  %v465_v23 = vsub.s32 3, %v452_v18  ;;  %s571_s18 = scalar_lea.vmem %s541_s2, 4096  ;;  %p576_p1 = scmp.lt.s32.totalorder %s541_s2, %s541_s2 }
   0xb   :  { %200 = vmatprep.mubr.f32.mxu0 %v593_v9  ;;  %313 = vmatprep.mubr.f32.mxu1 %v593_v9  ;;  %p572_p0 = scmp.ne.s32.totalorder %s541_s2, %s571_s18  ;;  %p577_p2 = scmp.lt.s32.totalorder %s571_s18, %s571_s18 }
   0xc   :  { %v684_v24 = vrot.slane %v449_v21, %v453_v19  ;;  %v686_v25 = vrot.slane %v449_v21, %v461_v20  ;;  %v688_v26 = vrot.slane %v449_v21, %v457_v22  ;;  %v690_v27 = vrot.slane %v449_v21, %v465_v23 }
   0xd   :  { %p578_p3 = por %p577_p2, %p576_p1 }
   0xe   :  { %553 = vmatmul.mubr.msk.f32.gmra.mxu0 %vm99_vm0, %v85_v11  ;;  %561 = vmatmul.mubr.msk.f32.gmra.mxu1 %vm99_vm0, %v85_v11 }
   0xf   :  { %206 = vmatprep.mubr.f32.mxu0 %v593_v9  ;;  %319 = vmatprep.mubr.f32.mxu1 %v593_v9  ;;  %p579_p4 = pnand %p578_p3, %p572_p0 }
  0x12   :  { %554 = vmatmul.mubr.msk.f32.gmra.mxu0 %vm99_vm0, %v86_v12  ;;  %562 = vmatmul.mubr.msk.f32.gmra.mxu1 %vm99_vm0, %v86_v12 }
  0x13   :  { %212 = vmatprep.mubr.f32.mxu0 %v593_v9  ;;  %325 = vmatprep.mubr.f32.mxu1 %v593_v9 }
  0x16   :  { %555 = vmatmul.mubr.msk.f32.gmra.mxu0 %vm99_vm0, %v87_v13  ;;  %563 = vmatmul.mubr.msk.f32.gmra.mxu1 %vm99_vm0, %v87_v13 }
  0x17   :  { %218 = vmatprep.mubr.f32.mxu0 %v593_v9  ;;  %331 = vmatprep.mubr.f32.mxu1 %v593_v9 }
  0x1a   :  { %556 = vmatmul.mubr.msk.f32.gmra.mxu0 %vm99_vm0, %v88_v14  ;;  %564 = vmatmul.mubr.msk.f32.gmra.mxu1 %vm99_vm0, %v88_v14 }
  0x1b   :  { %224 = vmatprep.mubr.f32.mxu0 %v593_v9  ;;  %337 = vmatprep.mubr.f32.mxu1 %v593_v9 }
  0x1e   :  { %557 = vmatmul.mubr.msk.f32.gmra.mxu0 %vm99_vm0, %v89_v15  ;;  %565 = vmatmul.mubr.msk.f32.gmra.mxu1 %vm99_vm0, %v89_v15 }
  0x1f   :  { %230 = vmatprep.mubr.f32.mxu0 %v593_v9  ;;  %343 = vmatprep.mubr.f32.mxu1 %v593_v9 }
  0x22   :  { %558 = vmatmul.mubr.msk.f32.gmra.mxu0 %vm99_vm0, %v90_v16  ;;  %566 = vmatmul.mubr.msk.f32.gmra.mxu1 %vm99_vm0, %v90_v16 }
  0xc6   :  { %v190_v28 = vpop.f32.mrf.mxu0  ;;  %v303_v29 = vpop.f32.mrf.mxu1 }
  0xc7   :  { %v471_v30 = vadd.f32 %v684_v24, %v190_v28  ;;  %v473_v31 = vadd.f32 %v686_v25, %v303_v29 }
  0xc8   :  { %v192_v32 = vpop.f32.mrf.mxu0  ;;  %v305_v33 = vpop.f32.mrf.mxu1 }
  0xc9   :  { %503 = vst [vmem:[#allocation3] sm:$0xff] %v471_v30  ;;  %505 = vst [vmem:[#allocation3 + $0x10] sm:$0xff] %v473_v31  ;;  %v472_v34 = vadd.f32 %v688_v26, %v192_v32  ;;  %v474_v35 = vadd.f32 %v690_v27, %v305_v33 }
  0xca   :  { %v196_v36 = vpop.f32.mrf.mxu0  ;;  %v309_v37 = vpop.f32.mrf.mxu1 }
  0xcb   :  { %504 = vst [vmem:[#allocation3 + $0x8] sm:$0xff] %v472_v34  ;;  %506 = vst [vmem:[#allocation3 + $0x18] sm:$0xff] %v474_v35  ;;  %v475_v38 = vadd.f32 %v684_v24, %v196_v36  ;;  %v477_v39 = vadd.f32 %v686_v25, %v309_v37 }
  0xcc   :  { %v198_v40 = vpop.f32.mrf.mxu0  ;;  %v311_v41 = vpop.f32.mrf.mxu1 }
  0xcd   :  { %507 = vst [vmem:[#allocation3 + $0x20] sm:$0xff] %v475_v38  ;;  %509 = vst [vmem:[#allocation3 + $0x30] sm:$0xff] %v477_v39  ;;  %v476_v42 = vadd.f32 %v688_v26, %v198_v40  ;;  %v478_v43 = vadd.f32 %v690_v27, %v311_v41 }
  0xce   :  { %v202_v44 = vpop.f32.mrf.mxu0  ;;  %v315_v45 = vpop.f32.mrf.mxu1 }
  0xcf   :  { %508 = vst [vmem:[#allocation3 + $0x28] sm:$0xff] %v476_v42  ;;  %510 = vst [vmem:[#allocation3 + $0x38] sm:$0xff] %v478_v43  ;;  %v479_v46 = vadd.f32 %v684_v24, %v202_v44  ;;  %v481_v47 = vadd.f32 %v686_v25, %v315_v45 }
  0xd0   :  { %v204_v48 = vpop.f32.mrf.mxu0  ;;  %v317_v49 = vpop.f32.mrf.mxu1 }
  0xd1   :  { %511 = vst [vmem:[#allocation3 + $0x40] sm:$0xff] %v479_v46  ;;  %513 = vst [vmem:[#allocation3 + $0x50] sm:$0xff] %v481_v47  ;;  %v480_v50 = vadd.f32 %v688_v26, %v204_v48  ;;  %v482_v51 = vadd.f32 %v690_v27, %v317_v49 }
  0xd2   :  { %v208_v52 = vpop.f32.mrf.mxu0  ;;  %v321_v53 = vpop.f32.mrf.mxu1 }
  0xd3   :  { %512 = vst [vmem:[#allocation3 + $0x48] sm:$0xff] %v480_v50  ;;  %514 = vst [vmem:[#allocation3 + $0x58] sm:$0xff] %v482_v51  ;;  %v483_v54 = vadd.f32 %v684_v24, %v208_v52  ;;  %v485_v55 = vadd.f32 %v686_v25, %v321_v53 }
  0xd4   :  { %v210_v56 = vpop.f32.mrf.mxu0  ;;  %v323_v57 = vpop.f32.mrf.mxu1 }
  0xd5   :  { %515 = vst [vmem:[#allocation3 + $0x60] sm:$0xff] %v483_v54  ;;  %517 = vst [vmem:[#allocation3 + $0x70] sm:$0xff] %v485_v55  ;;  %v484_v58 = vadd.f32 %v688_v26, %v210_v56  ;;  %v486_v59 = vadd.f32 %v690_v27, %v323_v57 }
  0xd6   :  { %v214_v60 = vpop.f32.mrf.mxu0  ;;  %v327_v61 = vpop.f32.mrf.mxu1 }
  0xd7   :  { %516 = vst [vmem:[#allocation3 + $0x68] sm:$0xff] %v484_v58  ;;  %518 = vst [vmem:[#allocation3 + $0x78] sm:$0xff] %v486_v59  ;;  %v487_v62 = vadd.f32 %v684_v24, %v214_v60  ;;  %v489_v63 = vadd.f32 %v686_v25, %v327_v61 }
  0xd8   :  { %v216_v0 = vpop.f32.mrf.mxu0  ;;  %v329_v1 = vpop.f32.mrf.mxu1 }
  0xd9   :  { %519 = vst [vmem:[#allocation3 + $0x80] sm:$0xff] %v487_v62  ;;  %521 = vst [vmem:[#allocation3 + $0x90] sm:$0xff] %v489_v63  ;;  %v488_v2 = vadd.f32 %v688_v26, %v216_v0  ;;  %v490_v3 = vadd.f32 %v690_v27, %v329_v1 }
  0xda   :  { %v220_v4 = vpop.f32.mrf.mxu0  ;;  %v333_v5 = vpop.f32.mrf.mxu1 }
  0xdb   :  { %520 = vst [vmem:[#allocation3 + $0x88] sm:$0xff] %v488_v2  ;;  %522 = vst [vmem:[#allocation3 + $0x98] sm:$0xff] %v490_v3  ;;  %v491_v6 = vadd.f32 %v684_v24, %v220_v4  ;;  %v493_v7 = vadd.f32 %v686_v25, %v333_v5 }
  0xdc   :  { %v222_v8 = vpop.f32.mrf.mxu0  ;;  %v335_v9 = vpop.f32.mrf.mxu1 }
  0xdd   :  { %523 = vst [vmem:[#allocation3 + $0xa0] sm:$0xff] %v491_v6  ;;  %525 = vst [vmem:[#allocation3 + $0xb0] sm:$0xff] %v493_v7  ;;  %v492_v10 = vadd.f32 %v688_v26, %v222_v8  ;;  %v494_v11 = vadd.f32 %v690_v27, %v335_v9 }
  0xde   :  { %v226_v12 = vpop.f32.mrf.mxu0  ;;  %v339_v13 = vpop.f32.mrf.mxu1 }
  0xdf   :  { %524 = vst [vmem:[#allocation3 + $0xa8] sm:$0xff] %v492_v10  ;;  %526 = vst [vmem:[#allocation3 + $0xb8] sm:$0xff] %v494_v11  ;;  %v495_v14 = vadd.f32 %v684_v24, %v226_v12  ;;  %v497_v15 = vadd.f32 %v686_v25, %v339_v13 }
  0xe0   :  { %v228_v16 = vpop.f32.mrf.mxu0  ;;  %v341_v17 = vpop.f32.mrf.mxu1 }
  0xe1   :  { %527 = vst [vmem:[#allocation3 + $0xc0] sm:$0xff] %v495_v14  ;;  %529 = vst [vmem:[#allocation3 + $0xd0] sm:$0xff] %v497_v15  ;;  %v496_v18 = vadd.f32 %v688_v26, %v228_v16  ;;  %v498_v19 = vadd.f32 %v690_v27, %v341_v17 }
  0xe2   :  { %v232_v20 = vpop.f32.mrf.mxu0  ;;  %v345_v21 = vpop.f32.mrf.mxu1 }
  0xe3   :  { %528 = vst [vmem:[#allocation3 + $0xc8] sm:$0xff] %v496_v18  ;;  %530 = vst [vmem:[#allocation3 + $0xd8] sm:$0xff] %v498_v19  ;;  %v499_v22 = vadd.f32 %v684_v24, %v232_v20  ;;  %v501_v23 = vadd.f32 %v686_v25, %v345_v21 }
  0xe4   :  { %v234_v28 = vpop.f32.mrf.mxu0  ;;  %v347_v29 = vpop.f32.mrf.mxu1 }
  0xe5   :  { %531 = vst [vmem:[#allocation3 + $0xe0] sm:$0xff] %v499_v22  ;;  %533 = vst [vmem:[#allocation3 + $0xf0] sm:$0xff] %v501_v23  ;;  %v500_v30 = vadd.f32 %v688_v26, %v234_v28  ;;  %v502_v31 = vadd.f32 %v690_v27, %v347_v29 }
  0xe7   :  { %532 = vst [vmem:[#allocation3 + $0xe8] sm:$0xff] %v500_v30  ;;  %534 = vst [vmem:[#allocation3 + $0xf8] sm:$0xff] %v502_v31 }
  0xe8   :  { %582 = shalt.err (!%p579_p4)
}
  0xe9   :  { %s595_s19 = smov 512   ;;  %s596_s20 = smov 32  }
  0xea   :  { %546 = dma.vmem_to_hbm [thread:$0]  %s541_s2, 4096, %s730_s3, [#allocation4], %s595_s19, %s595_s19, %s596_s20  }
  0xeb   :  { %591 = dma.done.wait [#allocation4], 4096  }
  0xec   :  { %592 = vsyncadd [#allocation4], 4294963200 }
  0xed   :  { %550 = vsyncpa [#allocation4], 1 }

</bundles_post_ra>
